<compile_context>
chip_gen: v6e
topology: v6e:2x2x1
jax: 0.10.0
libtpu: 0.0.40
codegen_flags: <defaults>
</compile_context>

<pallas_src>
import jax
import jax.numpy as jnp
from jax.experimental import pallas as pl
from jax.experimental.pallas import tpu as pltpu


# --------------------------------------------------------------------------- #
# VMEM budgeting helpers
# --------------------------------------------------------------------------- #
def _round_up(v, m):
    return ((v + m - 1) // m) * m


def _vmem_budget():
    """Per-generation VMEM budgets in bytes: (vmem_limit, per-pipeline-buffer)."""
    cap = 64 * 1024 * 1024            # v7x floor -> safe fallback on every chip
    try:
        cap = int(pltpu.get_tpu_info().vmem_capacity_bytes)
    except Exception:
        pass
    vmem_limit = int(cap * 0.75)      # v5e/v6e: ~96 MiB, v7x: ~48 MiB
    per_buffer = int(cap * 0.18)      # x double-buffer stays ~36% of physical VMEM
    return vmem_limit, per_buffer


def _sublane(itemsize):
    # Sublane tile of the second-minor dim: f32 -> 8, bf16 -> 16, int8 -> 32.
    return max(8, 32 // max(1, itemsize))


def _pick_c_chunk(C, HW, itemsize, per_buffer_budget, subl):
    """Largest channel chunk whose *padded* (sublane x 128-lane) VMEM footprint
    fits one pipeline buffer.  Returns a multiple of the sublane tile, or C."""
    row_bytes = _round_up(HW, 128) * itemsize
    max_rows = max(1, per_buffer_budget // row_bytes)
    if _round_up(C, subl) <= max_rows:
        return C
    chunk = max(subl, (max_rows // subl) * subl)
    return min(chunk, C)


# --------------------------------------------------------------------------- #
# Kernel 1: lane-dense channel sum/max reduction over (N, C, H*W)
# --------------------------------------------------------------------------- #
def _make_reduce_kernel(c_chunk, n_c, tail, slab):
    """x_ref: (c_chunk, HW) block of the input (original dtype).
       o_ref: (2, HW) f32 block, resident across the channel-chunk axis:
              row 0 = channel sum, row 1 = channel max."""

    def accumulate(x_ref, o_ref, nvalid):
        def step(off, rows):
            xs = x_ref[pl.ds(off, rows)].astype(jnp.float32)      # (rows, HW)
            o_ref[0:1, :] = o_ref[0:1, :] + jnp.sum(xs, axis=0, keepdims=True)
            o_ref[1:2, :] = jnp.maximum(o_ref[1:2, :],
                                        jnp.max(xs, axis=0, keepdims=True))

        n_full, rem = divmod(nvalid, slab)
        if 0 < n_full <= 4:
            # Short: fully unroll with static offsets.
            for i in range(n_full):
                step(i * slab, slab)
        elif n_full > 4:
            # Long: partially unrolled loop so the LLO scheduler can pack slots
            # without exploding code size.
            def body(i, carry):
                step(pl.multiple_of(i * slab, slab), slab)
                return carry
            jax.lax.fori_loop(0, n_full, body, 0, unroll=4)
        if rem > 0:
            step(n_full * slab, rem)

    def kernel(x_ref, o_ref):
        c = pl.program_id(1)

        @pl.when(c == 0)
        def _():
            o_ref[0:1, :] = jnp.zeros_like(o_ref[0:1, :])
            o_ref[1:2, :] = jnp.full_like(o_ref[1:2, :], -jnp.inf)

        if tail == c_chunk:
            # c_chunk divides C: every block is fully valid.
            accumulate(x_ref, o_ref, c_chunk)
        else:
            # Last block is partial: only reduce its statically-known valid rows
            # (the out-of-bounds rows of the edge block are never touched).
            @pl.when(c < n_c - 1)
            def _():
                accumulate(x_ref, o_ref, c_chunk)

            @pl.when(c == n_c - 1)
            def _():
                accumulate(x_ref, o_ref, tail)

    return kernel


# --------------------------------------------------------------------------- #
# Kernel 2: per-image kxk conv (2 -> 1 channels, no bias) + sigmoid
# --------------------------------------------------------------------------- #
def _make_conv_kernel(ksize, pad, H, W):
    """w_ref  : SMEM (2*k*k,) f32 taps, channel 0 pre-scaled by 1/C.
       f_ref  : VMEM (2, H, W) f32 [channel sum, channel max] for one image.
       o_ref  : VMEM (1, H, W) output block.
       pad_ref: VMEM (2, H+2p, W+2p) f32 zero-padded conv input."""

    def kernel(w_ref, f_ref, o_ref, pad_ref):
        # Zero every iteration: with "parallel" batch sharding across cores a
        # once-only border init would be unsafe, and this buffer is tiny.
        pad_ref[...] = jnp.zeros_like(pad_ref)
        pad_ref[0, pad:pad + H, pad:pad + W] = f_ref[0]   # sum * (w/C) == mean * w
        pad_ref[1, pad:pad + H, pad:pad + W] = f_ref[1]

        # Two interleaved accumulators break the long serial vadd chain; taps
        # are read as SMEM scalars (free broadcast from the scalar path).
        acc0 = jnp.zeros((H, W), jnp.float32)
        acc1 = jnp.zeros((H, W), jnp.float32)
        for ci in range(2):
            for kh in range(ksize):
                base = ci * ksize * ksize + kh * ksize
                partial = pad_ref[ci, kh:kh + H, 0:W] * w_ref[base]
                for kw in range(1, ksize):
                    partial = partial + pad_ref[ci, kh:kh + H, kw:kw + W] * w_ref[base + kw]
                if kh % 2 == 0:
                    acc0 = acc0 + partial
                else:
                    acc1 = acc1 + partial
        o_ref[0] = jax.nn.sigmoid(acc0 + acc1).astype(o_ref.dtype)

    return kernel


# --------------------------------------------------------------------------- #
# Wrapper
# --------------------------------------------------------------------------- #
def spatial_attention(x, weight, *, c_chunk=None):
    """x: (N, C, H, W); weight: (1, 2, k, k) conv weight, k in (3, 7), no bias."""
    N, C, H, W = x.shape
    ko, ki, kh, kw = weight.shape
    assert ko == 1 and ki == 2 and kh == kw and kh in (3, 7), "weight must be (1,2,k,k), k in (3,7)"
    ksize = int(kh)
    pad = ksize // 2
    HW = H * W

    itemsize = x.dtype.itemsize
    subl = _sublane(itemsize)
    vmem_limit, per_buffer = _vmem_budget()

    if c_chunk is None:
        c_chunk = _pick_c_chunk(C, HW, itemsize, per_buffer, subl)
    else:
        c_chunk = int(c_chunk)
        if c_chunk >= C:
            c_chunk = C
        elif c_chunk % subl != 0:           # block 2nd-minor dim must be a sublane multiple
            c_chunk = min(C, _round_up(c_chunk, subl))

    n_c = pl.cdiv(C, c_chunk)               # grid no longer requires divisibility
    tail = C - (n_c - 1) * c_chunk

    # ---- pass 1: lane-dense channel reduction -> (N, 2, H*W) f32 ----------
    x_flat = x.reshape(N, C, HW)             # free row-major flatten
    reduce_kernel = _make_reduce_kernel(c_chunk, n_c, tail, subl)
    feat = pl.pallas_call(
        reduce_kernel,
        out_shape=jax.ShapeDtypeStruct((N, 2, HW), jnp.float32),
        grid_spec=pltpu.PrefetchScalarGridSpec(
            num_scalar_prefetch=0,
            grid=(N, n_c),
            in_specs=[pl.BlockSpec((None, c_chunk, HW), lambda n, c: (n, c, 0))],
            out_specs=pl.BlockSpec((None, 2, HW), lambda n, c: (n, 0, 0)),
        ),
        compiler_params=pltpu.CompilerParams(
            dimension_semantics=("parallel", "arbitrary"),
            vmem_limit_bytes=vmem_limit,
        ),
    )(x_flat)

    # Fold 1/C of the channel mean into weight channel 0 (kernel 1 emits a sum).
    w = weight[0].astype(jnp.float32)
    w = w * jnp.array([1.0 / C, 1.0], jnp.float32)[:, None, None]
    w_flat = w.reshape(2 * ksize * ksize)

    # ---- pass 2: per-image kxk conv + sigmoid ------------------------------
    feat_img = feat.reshape(N, 2, H, W)
    conv_kernel = _make_conv_kernel(ksize, pad, H, W)
    out = pl.pallas_call(
        conv_kernel,
        out_shape=jax.ShapeDtypeStruct((N, 1, H, W), x.dtype),
        grid_spec=pltpu.PrefetchScalarGridSpec(
            num_scalar_prefetch=0,
            grid=(N,),
            in_specs=[
                pl.BlockSpec(memory_space=pltpu.MemorySpace.SMEM),            # conv taps
                pl.BlockSpec((None, 2, H, W), lambda n: (n, 0, 0, 0)),
            ],
            out_specs=pl.BlockSpec((None, 1, H, W), lambda n: (n, 0, 0, 0)),
            scratch_shapes=[
                pltpu.VMEM((2, H + 2 * pad, W + 2 * pad), jnp.float32),       # padded map
            ],
        ),
        compiler_params=pltpu.CompilerParams(
            dimension_semantics=("parallel",),
            vmem_limit_bytes=vmem_limit,
        ),
    )(w_flat, feat_img)
    return out


def spatial_attention_ref(x, weight):
    """Pure-JAX reference (mirrors the PyTorch forward)."""
    k = weight.shape[-1]
    pad = k // 2
    avg = jnp.mean(x.astype(jnp.float32), axis=1, keepdims=True)
    mx = jnp.max(x.astype(jnp.float32), axis=1, keepdims=True)
    feat = jnp.concatenate([avg, mx], axis=1)
    y = jax.lax.conv_general_dilated(
        feat, weight.astype(jnp.float32), window_strides=(1, 1),
        padding=((pad, pad), (pad, pad)),
        dimension_numbers=("NCHW", "OIHW", "NCHW"))
    return jax.nn.sigmoid(y)


if __name__ == "__main__":
    key = jax.random.PRNGKey(0)
    kx1, kw_, kx2, kx3, kx4 = jax.random.split(key, 5)

    # Deterministic conv weight (kaiming-uniform-like bound), shape (1, 2, 7, 7).
    fan_in = 2 * 7 * 7
    bound = 1.0 / (fan_in ** 0.5)
    weight = jax.random.uniform(kw_, (1, 2, 7, 7), jnp.float32,
                                minval=-bound, maxval=bound)

    # Case 1: whole channel axis in one lane-dense block (c_chunk == C).
    N, C, H, W = 2, 4, 16, 16
    x1 = jax.random.normal(kx1, (N, C, H, W), dtype=jnp.float32)
    out1 = jax.block_until_ready(spatial_attention(x1, weight))
    ref1 = spatial_attention_ref(x1, weight)
    assert out1.shape == (N, 1, H, W)
    assert jnp.allclose(out1, ref1, atol=3e-5, rtol=1e-5), "case 1 mismatch vs reference"

    # Case 2: C not divisible by c_chunk -> multi-chunk reduction with a tail chunk.
    x2 = jax.random.normal(kx2, (1, 11, 8, 32), dtype=jnp.float32)
    out2 = jax.block_until_ready(spatial_attention(x2, weight, c_chunk=8))
    ref2 = spatial_attention_ref(x2, weight)
    assert jnp.allclose(out2, ref2, atol=3e-5, rtol=1e-5), "case 2 mismatch vs reference"

    # Case 3: bf16 input (16-row sublane tile, f32 accumulation, bf16 output).
    x3 = jax.random.normal(kx3, (1, 16, 8, 16), dtype=jnp.bfloat16)
    out3 = jax.block_until_ready(spatial_attention(x3, weight))
    ref3 = spatial_attention_ref(x3.astype(jnp.float32), weight)
    assert jnp.allclose(out3.astype(jnp.float32), ref3, atol=1e-2, rtol=1e-2), \
        "case 3 mismatch vs reference"

    # Case 4: many slabs per chunk -> exercises the fori_loop(unroll=4) reduction path.
    x4 = jax.random.normal(kx4, (1, 48, 16, 16), dtype=jnp.float32)
    out4 = jax.block_until_ready(spatial_attention(x4, weight))
    ref4 = spatial_attention_ref(x4, weight)
    assert jnp.allclose(out4, ref4, atol=3e-5, rtol=1e-5), "case 4 mismatch vs reference"

    print("KERNEL_OK")
</pallas_src>

<mosaic_0001>
module attributes {stable_mosaic.version = 11 : i64} {
  func.func @kernel(%arg0: i32, %arg1: i32, %arg2: memref<1x4x256xf32, #tpu.memory_space<vmem>>, %arg3: memref<1x2x256xf32, #tpu.memory_space<vmem>>) attributes {dimension_semantics = [#tpu.dimension_semantics<parallel>, #tpu.dimension_semantics<arbitrary>], iteration_bounds = array<i64: 2, 1>, scalar_prefetch = 0 : i64, scratch_operands = 0 : i64, tpu.core_type = #tpu.core_type<tc>, window_params = [{transform_indices = @transform_0, window_bounds = array<i64: 1, 4, 256>}, {transform_indices = @transform_1, window_bounds = array<i64: 1, 2, 256>}]} {
    %c0_i32 = arith.constant 0 : i32
    %0 = arith.cmpi eq, %arg1, %c0_i32 : i32
    %1 = arith.extui %0 : i1 to i32
    %c0_i32_0 = arith.constant 0 : i32
    %2 = arith.cmpi ne, %1, %c0_i32_0 : i32
    scf.if %2 {
      %cst_15 = arith.constant 0.000000e+00 : f32
      %21 = vector.broadcast %cst_15 : f32 to vector<1x256xf32>
      %c0_16 = arith.constant 0 : index
      %c0_17 = arith.constant 0 : index
      %c0_18 = arith.constant 0 : index
      %22 = vector.load %arg3[%c0_16, %c0_17, %c0_18] : memref<1x2x256xf32, #tpu.memory_space<vmem>>, vector<1x1x256xf32>
      %23 = vector.shape_cast %22 : vector<1x1x256xf32> to vector<1x256xf32>
      %24 = vector.shape_cast %21 : vector<1x256xf32> to vector<1x1x256xf32>
      tpu.vector_store %arg3[%c0_16, %c0_17, %c0_18], %24 {strides = array<i32>} : memref<1x2x256xf32, #tpu.memory_space<vmem>>, vector<1x1x256xf32>,
      %cst_19 = arith.constant 0xFF800000 : f32
      %25 = vector.broadcast %cst_19 : f32 to vector<1x256xf32>
      %c0_20 = arith.constant 0 : index
      %c1_21 = arith.constant 1 : index
      %c0_22 = arith.constant 0 : index
      %26 = vector.load %arg3[%c0_20, %c1_21, %c0_22] : memref<1x2x256xf32, #tpu.memory_space<vmem>>, vector<1x1x256xf32>
      %27 = vector.shape_cast %26 : vector<1x1x256xf32> to vector<1x256xf32>
      %28 = vector.shape_cast %25 : vector<1x256xf32> to vector<1x1x256xf32>
      tpu.vector_store %arg3[%c0_20, %c1_21, %c0_22], %28 {strides = array<i32>} : memref<1x2x256xf32, #tpu.memory_space<vmem>>, vector<1x1x256xf32>,
    } else {
    }
    %c0 = arith.constant 0 : index
    %c0_1 = arith.constant 0 : index
    %c0_2 = arith.constant 0 : index
    %3 = vector.load %arg2[%c0, %c0_1, %c0_2] : memref<1x4x256xf32, #tpu.memory_space<vmem>>, vector<1x4x256xf32>
    %4 = vector.shape_cast %3 : vector<1x4x256xf32> to vector<4x256xf32>
    %c0_3 = arith.constant 0 : index
    %c0_4 = arith.constant 0 : index
    %c0_5 = arith.constant 0 : index
    %5 = vector.load %arg3[%c0_3, %c0_4, %c0_5] : memref<1x2x256xf32, #tpu.memory_space<vmem>>, vector<1x1x256xf32>
    %6 = vector.shape_cast %5 : vector<1x1x256xf32> to vector<1x256xf32>
    %cst = arith.constant dense<0.000000e+00> : vector<256xf32>
    %7 = vector.multi_reduction <add>, %4, %cst [0] : vector<4x256xf32> to vector<256xf32>
    %8 = vector.shape_cast %7 : vector<256xf32> to vector<1x256xf32>
    %9 = arith.addf %6, %8 : vector<1x256xf32>
    %c0_6 = arith.constant 0 : index
    %c0_7 = arith.constant 0 : index
    %c0_8 = arith.constant 0 : index
    %10 = vector.load %arg3[%c0_6, %c0_7, %c0_8] : memref<1x2x256xf32, #tpu.memory_space<vmem>>, vector<1x1x256xf32>
    %11 = vector.shape_cast %10 : vector<1x1x256xf32> to vector<1x256xf32>
    %12 = vector.shape_cast %9 : vector<1x256xf32> to vector<1x1x256xf32>
    tpu.vector_store %arg3[%c0_6, %c0_7, %c0_8], %12 {strides = array<i32>} : memref<1x2x256xf32, #tpu.memory_space<vmem>>, vector<1x1x256xf32>,
    %c0_9 = arith.constant 0 : index
    %c1 = arith.constant 1 : index
    %c0_10 = arith.constant 0 : index
    %13 = vector.load %arg3[%c0_9, %c1, %c0_10] : memref<1x2x256xf32, #tpu.memory_space<vmem>>, vector<1x1x256xf32>
    %14 = vector.shape_cast %13 : vector<1x1x256xf32> to vector<1x256xf32>
    %cst_11 = arith.constant dense<0xFF800000> : vector<256xf32>
    %15 = vector.multi_reduction <maximumf>, %4, %cst_11 [0] : vector<4x256xf32> to vector<256xf32>
    %16 = vector.shape_cast %15 : vector<256xf32> to vector<1x256xf32>
    %17 = arith.maximumf %14, %16 : vector<1x256xf32>
    %c0_12 = arith.constant 0 : index
    %c1_13 = arith.constant 1 : index
    %c0_14 = arith.constant 0 : index
    %18 = vector.load %arg3[%c0_12, %c1_13, %c0_14] : memref<1x2x256xf32, #tpu.memory_space<vmem>>, vector<1x1x256xf32>
    %19 = vector.shape_cast %18 : vector<1x1x256xf32> to vector<1x256xf32>
    %20 = vector.shape_cast %17 : vector<1x256xf32> to vector<1x1x256xf32>
    tpu.vector_store %arg3[%c0_12, %c1_13, %c0_14], %20 {strides = array<i32>} : memref<1x2x256xf32, #tpu.memory_space<vmem>>, vector<1x1x256xf32>,
    return
  }
  func.func @transform_0(%arg0: i32, %arg1: i32) -> (i32, i32, i32) {
    %c0_i32 = arith.constant 0 : i32
    %c0_i32_0 = arith.constant 0 : i32
    return %arg0, %arg1, %c0_i32 : i32, i32, i32
  }
  func.func @transform_1(%arg0: i32, %arg1: i32) -> (i32, i32, i32) {
    %c0_i32 = arith.constant 0 : i32
    %c0_i32_0 = arith.constant 0 : i32
    %c0_i32_1 = arith.constant 0 : i32
    return %arg0, %c0_i32, %c0_i32_0 : i32, i32, i32
  }
}

</mosaic_0001>

<bundles_post_ra>
// kernel: tpu_custom_call.1
= control target key start
LH: loop header
LB: loop body
LE: loop exit
PB: predicated region body
PF: predicated region fallthrough
CT: control target
= control target key end

     0   :  { %6 = vsyncpa [#allocation3], 0  ;;  %s709_s0 = inlined_call_operand.hbm [shape: f32[2,4,256], index: 0, kind: input, shape index: {}]   ;;  %s710_s1 = inlined_call_operand.hbm [shape: f32[2,2,256], index: 1, kind: output, shape index: {}]  }
   0x1   :  { %8 = vsyncpa [#allocation3 + $0x1], 0 }
   0x2   :  { %9 = vsyncpa [#allocation4], 0 }
   0x3   :  { %11 = vsyncpa [#allocation4 + $0x1], 0  ;;  %s547_s6 = smov 0   ;;  %s549_s7 = smov 0  }
   0x4   :  { %s551_s8 = smov 0   ;;  %s553_s9 = smov 0  }
   0x5   :  { %s555_s10 = smov 0   ;;  %s557_s11 = smov 0  }
   0x6 LB: > { %s336_s12 = sadd.s32 4294967295, %s530_s11   ;;  %s337_s13 = sadd.s32 4294967294, %s530_s11   ;;  %s530_s11 = sphi %s557_s11, %s17_s11   ;;  %s526_s10 = sphi %s555_s10, %s724_s10   ;;  %s522_s9 = sphi %s553_s9, %s723_s9   ;;  %s518_s8 = sphi %s551_s8, %s722_s8   ;;  %s514_s7 = sphi %s549_s7, %s721_s7   ;;  %s510_s6 = sphi %s547_s6, %s720_s6  }
   0x7   : > { %s29_s14 = sadd.s32 1, %s526_s10  ;;  %s38_s15 = sadd.s32 1, %s518_s8 }
   0x8   : > { %p31_p0 = scmp.ge.s32.totalorder %s29_s14, 2  ;;  %p45_p1 = scmp.ne.s32.totalorder %s518_s8, %s514_s7 }
   0x9   : > { %p46_p2 = scmp.eq.s32.totalorder %s530_s11, 0  ;;  %p51_p3 = scmp.ne.s32.totalorder %s514_s7, %s510_s6 }
   0xa   : > { %s726_s14 = smov (%p31_p0, %s29_s14), 0  ;;  %p52_p5 = scmp.eq.s32.totalorder %s336_s12, 0 }
   0xb   : > { %p588_p4 = por %p46_p2, %p45_p1  ;;  %s33_s17 = ssub.s32 %s526_s10, %s726_s14 }
   0xc   : > { %p75_p6 = scmp.eq.s32.totalorder %s336_s12, 1  ;;  %p36_p7 = scmp.eq.s32.totalorder %s33_s17, 0 }
   0xd   : > { %p594_p8 = por %p52_p5, %p51_p3  ;;  %p81_p10 = scmp.eq.s32.totalorder %s337_s13, 1 }
   0xe   : > { %p598_p9 = por %p75_p6, %p45_p1  ;;  %p368_p13 = scmp.lt.s32.totalorder %s530_s11, 2 }
   0xf   : > { %s603_s20 = scalar_select %p36_p7, %s518_s8, %s38_s15  }
  0x10   : > { %p605_p11 = por %p81_p10, %p51_p3  ;;  %s101_s22 = sand.u32 1, %s518_s8  }
  0x11   : > { %s340_s23 = sshll.u32 %s101_s22, 3  ;;  %s354_s24 = sshll.u32 %s526_s10, 7 }
  0x12   : > { %s714_s21 = scalar_select %p605_p11, 1, 0 }
  0x13   : > { %s113_s27 = scalar_lea.hbm %s709_s0, %s354_s24  ;;  %s105_s28 = scalar_lea.vmem [#allocation2], %s340_s23 }
  0x14   : > { %s115_s29 = sshll.u32 %s105_s28, 4  ;;  %p618_p0 = pnand %p368_p13, %p588_p4  ;;  %s116_s29 = int_to_ptr.vmem [resolvable:$true] %s115_s29 }
  0x15   : > { %p343_p1 = scmp.ge.s32.totalorder %s530_s11, 1  ;;  %p120_p2 = scmp.lt.s32.totalorder %s530_s11, 3 }
  0x16   : > { %s102_s2 = scalar_lea.sflag [#allocation3], %s101_s22  ;;  %p424_p3 = pneg %p618_p0 }
  0x17   : > { %s435_s3 = scalar_lea.vmem %s116_s29, 128  ;;  %s532_s4 = smov [#allocation2]  }
  0x18   : > { %p436_p5 = scmp.ne.s32.totalorder %s116_s29, %s435_s3  ;;  %s440_s5 = sshll.u32 %s532_s4, 4  ;;  %s441_s5 = int_to_ptr.vmem [resolvable:$false] %s440_s5 }
  0x19   : > { %s442_s12 = scalar_lea.vmem %s441_s5, 256  ;;  %p443_p10 = scmp.lt.s32.totalorder %s116_s29, %s441_s5 }
  0x1a   : > { %p438_p6 = pnand %p436_p5, %p424_p3  ;;  %p444_p12 = scmp.lt.s32.totalorder %s442_s12, %s435_s3 }
  0x1c   : > { %p439_p7 = pneg %p438_p6  ;;  %p445_p4 = por %p444_p12, %p443_p10 }
  0x1e   : > { %p446_p13 = pnand %p445_p4, %p439_p7 }
  0x20   : > { %449 = shalt.err (!%p446_p13)
}
  0x21   : > { %363 = dma.hbm_to_vmem [thread:$0]  (!%p618_p0), %s113_s27, 128, %s116_s29, %s102_s2  }
  0x22   : > { %p121_p11 = pnand %p343_p1, %p120_p2 }
  0x23   : > { %s633_s13 = sand.u32 (!%p121_p11), 1, %s514_s7  }
  0x24   : > { %124 = sbr.rel (%p121_p11) target bundleno = 80 (0x50), region = 24  ;;  %s344_s15 = sshll.u32 (!%p121_p11), %s633_s13, 3 }
  0x25   : > { %s127_s16 = scalar_lea.sflag (!%p121_p11), [#allocation3], %s633_s13  ;;  %s130_s17 = scalar_lea.vmem (!%p121_p11), [#allocation2], %s344_s15 }
  0x29   : > { %501 = dma.done.wait (%p594_p8), %s127_s16, 128  }
  0x2a   : > { %503 = vsyncadd (%p594_p8), %s127_s16, 4294967168  ;;  %s345_s22 = sshll.u32 %s633_s13, 2  ;;  %v153_v0 = vlaneseq  ;;  %v533_v2 = vmov 0.0   ;;  %v534_v3 = vmov -inf   ;;  %vm165_vm1 = vcmask 1043456   ;;  %v160_v4 = vld [vmem:[%s130_s17] sm:$0xff] }
  0x2b   : > { %s646_s23 = scalar_lea.vmem [#allocation5], %s345_s22  ;;  %v163_v5 = vcombine.high %v160_v4, %v160_v4  ;;  %v166_v6 = vsel %vm165_vm1, %v160_v4, 0.0  ;;  %v206_v7 = vsel %vm165_vm1, %v160_v4, -inf  ;;  %v535_v16 = vmov 1966171168   ;;  %s355_s18 = sshll.u32 %s522_s9, 6 }
  0x2c   : > { %vm642_vm0 = vcmp.lt.s32.totalorder %v153_v0, 256  ;;  %v167_v8 = vrot.slane %v166_v6, 4  ;;  %v207_v9 = vrot.slane %v206_v7, 4  ;;  %v184_v17 = vunpack.c.l.s4 %v535_v16  ;;  %s255_s24 = sshll.u32 %s646_s23, 4  ;;  %s661_s27 = scalar_lea.hbm %s710_s1, %s355_s18  ;;  %s256_s24 = int_to_ptr.vmem [resolvable:$true] %s255_s24 }
  0x2d   : > { %157 = vst.msk [vmem:[%s646_s23] ss:$2 sm:$0x3] %vm642_vm0, %v533_v2  ;;  %346 = vst.msk [vmem:[%s646_s23 + $0x1] ss:$2 sm:$0x3] %vm642_vm0, %v534_v3 }
  0x2e   : > { %v173_v10 = vsel %vm165_vm1, %v163_v5, 0.0  ;;  %v213_v11 = vsel %vm165_vm1, %v163_v5, -inf  ;;  %v168_v12 = vadd.f32 %v167_v8, %v166_v6  ;;  %v208_v14 = vmax.f32 %v206_v7, %v207_v9  ;;  %s241_s9 = scalar_lea.sflag [#allocation4], %s633_s13  ;;  %s450_s28 = scalar_lea.vmem %s256_s24, 64 }
  0x2f   : > { %v174_v13 = vrot.slane %v173_v10, 4  ;;  %v214_v15 = vrot.slane %v213_v11, 4  ;;  %v185_v26 = vunpack.c.0.s8 %v184_v17  ;;  %v187_v27 = vshrl.u32 %v153_v0, 7  ;;  %p451_p8 = scmp.ne.s32.totalorder %s256_s24, %s450_s28  ;;  %s536_s29 = smov [#allocation5]  }
  0x30   : > { %v169_v18 = vrot.slane %v168_v12, 2  ;;  %v209_v20 = vrot.slane %v208_v14, 2  ;;  %s454_s30 = sshll.u32 %s536_s29, 4  ;;  %s455_s30 = int_to_ptr.vmem [resolvable:$false] %s454_s30 }
  0x31   : > { %v175_v19 = vadd.f32 %v174_v13, %v173_v10  ;;  %v215_v21 = vmax.f32 %v213_v11, %v214_v15  ;;  %v188_v36 = vsub.s32 %v185_v26, %v187_v27  ;;  %p452_p11 = pnand %p451_p8, %p598_p9  ;;  %s456_s2 = scalar_lea.vmem %s455_s30, 128 }
  0x32   : > { %v170_v22 = vadd.f32 %v169_v18, %v168_v12  ;;  %v210_v24 = vmax.f32 %v208_v14, %v209_v20  ;;  %p457_p0 = scmp.lt.s32.totalorder %s256_s24, %s455_s30  ;;  %p458_p1 = scmp.lt.s32.totalorder %s456_s2, %s450_s28 }
  0x33   : > { %v176_v23 = vrot.slane %v175_v19, 2  ;;  %v216_v25 = vrot.slane %v215_v21, 2  ;;  %p453_p12 = pneg %p452_p11 }
  0x34   : > { %v171_v28 = vrot.slane %v170_v22, 1  ;;  %v211_v30 = vrot.slane %v210_v24, 1  ;;  %v161_v43 = vld [vmem:[%s646_s23] ss:$2 sm:$0x3]  ;;  %p459_p2 = por %p458_p1, %p457_p0 }
  0x35   : > { %v177_v29 = vadd.f32 %v176_v23, %v175_v19  ;;  %v217_v31 = vmax.f32 %v215_v21, %v216_v25  ;;  %v347_v44 = vld [vmem:[%s646_s23 + $0x1] ss:$2 sm:$0x3] }
  0x36   : > { %v172_v32 = vadd.f32 %v171_v28, %v170_v22  ;;  %v212_v34 = vmax.f32 %v210_v24, %v211_v30  ;;  %p460_p3 = pnand %p459_p2, %p453_p12 }
  0x37   : > { %v178_v33 = vrot.slane %v177_v29, 1  ;;  %v218_v35 = vrot.slane %v217_v31, 1 }
  0x39   : > { %v179_v37 = vadd.f32 %v178_v33, %v177_v29  ;;  %v219_v38 = vmax.f32 %v217_v31, %v218_v35 }
  0x3b   : > { %v182_v39 = vcombine.low %v172_v32, %v179_v37  ;;  %v222_v40 = vcombine.low %v212_v34, %v219_v38 }
  0x3d   : > { %v189_v41 = vrot.slane %v182_v39, %v188_v36  ;;  %v229_v42 = vrot.slane %v222_v40, %v188_v36 }
  0x3f   : > { %v196_v45 = vrot.slane %v189_v41, %v188_v36  ;;  %v236_v46 = vrot.slane %v229_v42, %v188_v36 }
  0x41   : > { %v198_v47 = vadd.f32 %v196_v45, %v161_v43  ;;  %v238_v48 = vmax.f32 %v347_v44, %v236_v46 }
  0x43   : > { %203 = vst.msk [vmem:[%s646_s23] ss:$2 sm:$0x3] %vm642_vm0, %v198_v47  ;;  %348 = vst.msk [vmem:[%s646_s23 + $0x1] ss:$2 sm:$0x3] %vm642_vm0, %v238_v48 }
  0x44   : > { %463 = shalt.err (!%p460_p3)
}
  0x45   : > { %s464_s3 = scalar_lea.hbm %s661_s27, 64  ;;  %s468_s12 = scalar_lea.hbm %s710_s1, 128 }
  0x46   : > { %p465_p5 = scmp.ne.s32.totalorder %s661_s27, %s464_s3  ;;  %p469_p10 = scmp.lt.s32.totalorder %s661_s27, %s710_s1 }
  0x47   : > { %p470_p4 = scmp.lt.s32.totalorder %s468_s12, %s464_s3 }
  0x48   : > { %p466_p6 = pnand %p465_p5, %p598_p9 }
  0x49   : > { %p471_p13 = por %p470_p4, %p469_p10 }
  0x4a   : > { %p467_p7 = pneg %p466_p6 }
  0x4c   : > { %p472_p8 = pnand %p471_p13, %p467_p7 }
  0x4e   : > { %475 = shalt.err (!%p472_p8)
}
  0x4f   : > { %358 = dma.vmem_to_hbm [thread:$0]  (%p598_p9), %s256_s24, 64, %s661_s27, %s241_s9  }
  0x50 PF: > { %s267_s16 = sand.u32 1, %s510_s6   ;;  %p718_p11 = scmp.ne.s32.totalorder %s714_s21, 0 }
  0x51   : > { %p719_p12 = scmp.ge.s32.totalorder %s530_s11, 2  ;;  %s268_s17 = scalar_lea.sflag [#allocation4], %s267_s16 }
  0x53   : > { %p365_p0 = pnand %p719_p12, %p718_p11 }
  0x55   : > { %p366_p1 = pneg %p365_p0 }
  0x57   : > { %505 = dma.done.wait (%p366_p1), %s268_s17, 64  }
  0x58   : > { %507 = vsyncadd (%p366_p1), %s268_s17, 4294967232  ;;  %s17_s11 = sadd.s32 1, %s530_s11   ;;  %s720_s6 = smov %s514_s7 }
  0x59   : > { %p14_p2 = scmp.ge.s32.totalorder %s17_s11, 4   ;;  %s721_s7 = smov %s518_s8 }
  0x5a   : > { %s722_s8 = smov %s603_s20  ;;  %s723_s9 = smov %s526_s10 }
  0x5b   : > { %s724_s10 = smov %s726_s14  ;;  %16 = sbr.rel (!%p14_p2) target bundleno = 6 (0x6), region = 75 }
  0x60   :  { %273 = vsyncpa [#allocation3], 1 }
  0x61   :  { %275 = vsyncpa [#allocation3 + $0x1], 1 }
  0x62   :  { %276 = vsyncpa [#allocation4], 1 }
  0x63   :  { %278 = vsyncpa [#allocation4 + $0x1], 1 }

</bundles_post_ra>
